<compile_context>
chip_gen: v7x
topology: tpu7x:2x2x1
jax: 0.10.0
libtpu: 0.0.40
codegen_flags: <defaults>
</compile_context>

<pallas_src>
import functools

import jax
import jax.numpy as jnp
from jax.experimental import pallas as pl
from jax.experimental.pallas import tpu as pltpu

_LANE = 128
_SUBLANE = 8
_BN_EPS = 1e-5
_H_TYPE = 512                                   # type-head hidden width
_NEG_FILL = float(jnp.finfo(jnp.float32).min)   # softmax mask for padded lanes


def _round_up(n, m):
    return ((n + m - 1) // m) * m


# ----------------------------------------------------------------------------
# Kernels
# ----------------------------------------------------------------------------
def _fused_kernel(x_ref, w1_ref, b1_ref, w2_ref, b2_ref, out_ref, *, n_type_pad):
    """Both heads in one pass.
       type : softmax(fc2(relu(bn1(fc1(x)))))   (BN folded into fc1)
       level: fc2(relu(bn1(fc1(x))))            (BN folded into fc1)
       fc1 / fc2 of the two heads are fused (concat / block-diagonal weights).
       Output lanes [0, n_type_pad) = type softmax, [n_type_pad, :) = level logits.
    """
    xb = x_ref[...].astype(jnp.bfloat16)

    h = jnp.dot(xb, w1_ref[...], preferred_element_type=jnp.float32) + b1_ref[...]
    h = jnp.maximum(h, 0.0)                       # relu (f32 on the VPU)
    z = jnp.dot(h.astype(jnp.bfloat16), w2_ref[...],
                preferred_element_type=jnp.float32) + b2_ref[...]
    # TODO(synk): Dropout(p=0.5) is identity in inference mode.

    # ---- type head softmax over lanes [0, n_type_pad) ----
    t = z[:, :n_type_pad]                         # static slice at lane boundary
    m = jnp.max(t, axis=-1, keepdims=True)
    e = jnp.exp(t - m)                            # padded lanes (bias=f32 min) -> 0
    s = jnp.sum(e, axis=-1, keepdims=True)
    r = pl.reciprocal(s, approx=True)             # EUP vrcp (off the VPU path)
    r = r * (2.0 - s * r)                         # one Newton step -> ~f32 accuracy
    out_ref[:, :n_type_pad] = e * r

    # ---- level head logits ----
    out_ref[:, n_type_pad:] = z[:, n_type_pad:]


def _type_only_kernel(x_ref, w1_ref, b1_ref, w2_ref, b2_ref, out_ref):
    """Pre-training path: type head only (softmax(fc2(relu(bn1(fc1(x))))))."""
    xb = x_ref[...].astype(jnp.bfloat16)
    h = jnp.dot(xb, w1_ref[...], preferred_element_type=jnp.float32) + b1_ref[...]
    h = jnp.maximum(h, 0.0)
    z = jnp.dot(h.astype(jnp.bfloat16), w2_ref[...],
                preferred_element_type=jnp.float32) + b2_ref[...]
    m = jnp.max(z, axis=-1, keepdims=True)
    e = jnp.exp(z - m)
    s = jnp.sum(e, axis=-1, keepdims=True)
    r = pl.reciprocal(s, approx=True)
    r = r * (2.0 - s * r)
    out_ref[...] = e * r


# ----------------------------------------------------------------------------
# Parameter preparation: fold BN, fuse the two heads, pad to lane multiples
# ----------------------------------------------------------------------------
def _fold_bn_into_fc1(w1, b1, gamma, beta, mean, var):
    scale = gamma * jax.lax.rsqrt(var + _BN_EPS)          # (1, H)
    return w1 * scale, (b1 - mean) * scale + beta


def prepare_params(type_params, level_params, feature_size,
                   distortion_type_len, distortion_level_len):
    T = distortion_type_len
    LT = distortion_level_len * distortion_type_len
    n_type_pad = _round_up(T, _LANE)
    n_level_pad = _round_up(LT, _LANE)
    h_level_pad = _round_up(feature_size, _LANE)
    h_tot = _H_TYPE + h_level_pad
    n_tot = n_type_pad + n_level_pad

    tw1, tb1 = _fold_bn_into_fc1(type_params["w1"], type_params["b1"],
                                 type_params["gamma"], type_params["beta"],
                                 type_params["mean"], type_params["var"])
    lw1, lb1 = _fold_bn_into_fc1(level_params["w1"], level_params["b1"],
                                 level_params["gamma"], level_params["beta"],
                                 level_params["mean"], level_params["var"])

    # Fused fc1: W1 = [type (F,512) | level (F,F) zero-padded to (F,128)]
    w1 = jnp.zeros((feature_size, h_tot), jnp.float32)
    w1 = w1.at[:, :_H_TYPE].set(tw1)
    w1 = w1.at[:, _H_TYPE:_H_TYPE + feature_size].set(lw1)
    b1 = jnp.zeros((1, h_tot), jnp.float32)
    b1 = b1.at[:, :_H_TYPE].set(tb1)
    b1 = b1.at[:, _H_TYPE:_H_TYPE + feature_size].set(lb1)

    # Fused block-diagonal fc2: (h_tot, n_tot)
    w2 = jnp.zeros((h_tot, n_tot), jnp.float32)
    w2 = w2.at[:_H_TYPE, :T].set(type_params["w2"])
    w2 = w2.at[_H_TYPE:_H_TYPE + feature_size,
               n_type_pad:n_type_pad + LT].set(level_params["w2"])
    b2 = jnp.zeros((1, n_tot), jnp.float32)
    b2 = b2.at[:, :T].set(type_params["b2"])
    b2 = b2.at[:, T:n_type_pad].set(_NEG_FILL)   # mask padded type lanes (f32 bias)
    b2 = b2.at[:, n_type_pad:n_type_pad + LT].set(level_params["b2"])

    return dict(
        # full fused params (both heads)
        w1=w1.astype(jnp.bfloat16), b1=b1,
        w2=w2.astype(jnp.bfloat16), b2=b2,
        # type-only slices for the pre-training path (half the weight bytes)
        t_w1=w1[:, :_H_TYPE].astype(jnp.bfloat16),
        t_b1=b1[:, :_H_TYPE],
        t_w2=w2[:_H_TYPE, :n_type_pad].astype(jnp.bfloat16),
        t_b2=b2[:, :n_type_pad],
    )


# ----------------------------------------------------------------------------
# Forward wrapper (batch grid, weights VMEM-resident, one lane-dense output)
# ----------------------------------------------------------------------------
@functools.partial(jax.jit, static_argnums=(2, 3, 4, 5))
def classification_forward(x, prepared, distortion_type_len,
                           distortion_level_len, is_pre_training=False,
                           tile_b=512):
    B, F = x.shape
    T = distortion_type_len
    LT = distortion_level_len * distortion_type_len
    n_type_pad = _round_up(T, _LANE)
    n_level_pad = _round_up(LT, _LANE)
    n_tot = n_type_pad + n_level_pad

    # Batch tiling: tile up to `tile_b` rows per grid step; pad B to a multiple.
    tb = min(tile_b, _round_up(B, _SUBLANE))
    bp = _round_up(B, tb)
    if bp != B:
        x = jnp.pad(x, ((0, bp - B), (0, 0)))
    grid = (bp // tb,)

    cparams = pltpu.CompilerParams(dimension_semantics=("parallel",))
    x_spec = pl.BlockSpec((tb, F), lambda i: (i, 0))

    def _wspec(a):
        # Full-array block; constant index_map -> stays VMEM-resident across steps.
        return pl.BlockSpec(a.shape, lambda i: (0,) * a.ndim)

    if is_pre_training:
        args = (x, prepared["t_w1"], prepared["t_b1"],
                prepared["t_w2"], prepared["t_b2"])
        out = pl.pallas_call(
            _type_only_kernel,
            out_shape=jax.ShapeDtypeStruct((bp, n_type_pad), jnp.float32),
            grid=grid,
            in_specs=[x_spec] + [_wspec(a) for a in args[1:]],
            out_specs=pl.BlockSpec((tb, n_type_pad), lambda i: (i, 0)),
            compiler_params=cparams,
        )(*args)
        return out[:B, :T], None

    args = (x, prepared["w1"], prepared["b1"], prepared["w2"], prepared["b2"])
    out = pl.pallas_call(
        functools.partial(_fused_kernel, n_type_pad=n_type_pad),
        out_shape=jax.ShapeDtypeStruct((bp, n_tot), jnp.float32),
        grid=grid,
        in_specs=[x_spec] + [_wspec(a) for a in args[1:]],
        out_specs=pl.BlockSpec((tb, n_tot), lambda i: (i, 0)),
        compiler_params=cparams,
    )(*args)

    pred_type = out[:B, :T]
    # x.view(-1, level_len, type_len) — row-major reshape, same as jnp.reshape
    pred_level = out[:B, n_type_pad:n_type_pad + LT].reshape(
        -1, distortion_level_len, distortion_type_len)
    return pred_type, pred_level


# ----------------------------------------------------------------------------
# Deterministic parameter init (PyTorch Linear weight (out,in) stored (in,out))
# ----------------------------------------------------------------------------
def _init_linear(key, fan_in, fan_out):
    kw, kb = jax.random.split(key)
    bound = 1.0 / jnp.sqrt(fan_in)
    w = jax.random.uniform(kw, (fan_in, fan_out), jnp.float32, -bound, bound)
    b = jax.random.uniform(kb, (1, fan_out), jnp.float32, -bound, bound)
    return w, b


def _init_bn(key, n):
    kg, kb = jax.random.split(key)
    gamma = 1.0 + 0.1 * jax.random.normal(kg, (1, n), jnp.float32)
    beta = 0.1 * jax.random.normal(kb, (1, n), jnp.float32)
    mean = jnp.zeros((1, n), jnp.float32)
    var = jnp.ones((1, n), jnp.float32)
    return gamma, beta, mean, var


def init_params(key, feature_size, distortion_type_len, distortion_level_len):
    k1, k2, k3, k4, k5, k6 = jax.random.split(key, 6)
    # Multi_Classification_Type: fc1 F->512, bn1(512), fc2 512->T
    tw1, tb1 = _init_linear(k1, feature_size, 512)
    tg, tbe, tmu, tvar = _init_bn(k2, 512)
    tw2, tb2 = _init_linear(k3, 512, distortion_type_len)
    type_params = dict(w1=tw1, b1=tb1, gamma=tg, beta=tbe, mean=tmu, var=tvar,
                       w2=tw2, b2=tb2)
    # Multi_Classification_Level: fc1 F->F, bn1(F), fc2 F->L*T
    lw1, lb1 = _init_linear(k4, feature_size, feature_size)
    lg, lbe, lmu, lvar = _init_bn(k5, feature_size)
    lw2, lb2 = _init_linear(k6, feature_size,
                            distortion_level_len * distortion_type_len)
    level_params = dict(w1=lw1, b1=lb1, gamma=lg, beta=lbe, mean=lmu, var=lvar,
                        w2=lw2, b2=lb2)
    return type_params, level_params


# ----------------------------------------------------------------------------
# Pure-JAX reference (for correctness check)
# ----------------------------------------------------------------------------
def _reference(x, type_params, level_params, L, T):
    def head(p):
        h = x @ p["w1"] + p["b1"]
        h = (h - p["mean"]) * jax.lax.rsqrt(p["var"] + _BN_EPS) * p["gamma"] + p["beta"]
        h = jnp.maximum(h, 0.0)
        return h @ p["w2"] + p["b2"]
    ref_type = jax.nn.softmax(head(type_params), axis=1)
    ref_level = head(level_params).reshape(-1, L, T)
    return ref_type, ref_level


# ----------------------------------------------------------------------------
# Main
# ----------------------------------------------------------------------------
if __name__ == "__main__":
    feature_size = 32
    distortion_type_len = 5
    distortion_level_len = 4
    batch = 8  # patch_num-worth of feature vectors

    key = jax.random.PRNGKey(0)
    kx, kp, kx2 = jax.random.split(key, 3)
    x = jax.random.normal(kx, (batch, feature_size), jnp.float32)
    type_params, level_params = init_params(kp, feature_size,
                                            distortion_type_len,
                                            distortion_level_len)
    prepared = prepare_params(type_params, level_params, feature_size,
                              distortion_type_len, distortion_level_len)

    # ---- main inference path (both heads) ----
    pred_type, pred_level = classification_forward(
        x, prepared, distortion_type_len, distortion_level_len, False, 512)
    pred_type = jax.block_until_ready(pred_type)
    pred_level = jax.block_until_ready(pred_level)

    assert pred_type.shape == (batch, distortion_type_len)
    assert pred_level.shape == (batch, distortion_level_len, distortion_type_len)
    assert jnp.allclose(jnp.sum(pred_type, axis=1), 1.0, atol=1e-5)

    ref_type, ref_level = _reference(x, type_params, level_params,
                                     distortion_level_len, distortion_type_len)
    # bf16 weights -> loose tolerance vs f32 reference (intentional inference trade)
    assert jnp.allclose(pred_type, ref_type, atol=5e-2)
    assert jnp.allclose(pred_level, ref_level, atol=5e-2)

    # ---- pre-training path (type head only, level head skipped) ----
    pt_type, pt_level = classification_forward(
        x, prepared, distortion_type_len, distortion_level_len, True, 512)
    pt_type = jax.block_until_ready(pt_type)
    assert pt_level is None
    assert jnp.allclose(pt_type, ref_type, atol=5e-2)

    # ---- batch-grid path (grid > 1, batch padding) ----
    batch2 = 40
    x2 = jax.random.normal(kx2, (batch2, feature_size), jnp.float32)
    p2_type, p2_level = classification_forward(
        x2, prepared, distortion_type_len, distortion_level_len, False, 16)
    p2_type = jax.block_until_ready(p2_type)
    p2_level = jax.block_until_ready(p2_level)
    r2_type, r2_level = _reference(x2, type_params, level_params,
                                   distortion_level_len, distortion_type_len)
    assert p2_type.shape == (batch2, distortion_type_len)
    assert p2_level.shape == (batch2, distortion_level_len, distortion_type_len)
    assert jnp.allclose(p2_type, r2_type, atol=5e-2)
    assert jnp.allclose(p2_level, r2_level, atol=5e-2)

    print("KERNEL_OK")
</pallas_src>

<mosaic_0001>
module attributes {stable_mosaic.version = 11 : i64} {
  func.func @_fused_kernel(%arg0: i32, %arg1: memref<8x32xf32, #tpu.memory_space<vmem>>, %arg2: memref<32x640xbf16, #tpu.memory_space<vmem>>, %arg3: memref<1x640xf32, #tpu.memory_space<vmem>>, %arg4: memref<640x256xbf16, #tpu.memory_space<vmem>>, %arg5: memref<1x256xf32, #tpu.memory_space<vmem>>, %arg6: memref<8x256xf32, #tpu.memory_space<vmem>>) attributes {dimension_semantics = [#tpu.dimension_semantics<parallel>], iteration_bounds = array<i64: 1>, scalar_prefetch = 0 : i64, scratch_operands = 0 : i64, tpu.core_type = #tpu.core_type<tc>, window_params = [{transform_indices = @transform_0, window_bounds = array<i64: 8, 32>}, {pipeline_mode = #tpu.pipeline_mode<synchronous>, transform_indices = @transform_1, window_bounds = array<i64: 32, 640>}, {pipeline_mode = #tpu.pipeline_mode<synchronous>, transform_indices = @transform_2, window_bounds = array<i64: 1, 640>}, {pipeline_mode = #tpu.pipeline_mode<synchronous>, transform_indices = @transform_3, window_bounds = array<i64: 640, 256>}, {pipeline_mode = #tpu.pipeline_mode<synchronous>, transform_indices = @transform_4, window_bounds = array<i64: 1, 256>}, {transform_indices = @transform_5, window_bounds = array<i64: 8, 256>}]} {
    %c0 = arith.constant 0 : index
    %c0_0 = arith.constant 0 : index
    %0 = vector.load %arg1[%c0, %c0_0] : memref<8x32xf32, #tpu.memory_space<vmem>>, vector<8x32xf32>
    %1 = arith.truncf %0 : vector<8x32xf32> to vector<8x32xbf16>
    %c0_1 = arith.constant 0 : index
    %c0_2 = arith.constant 0 : index
    %2 = vector.load %arg2[%c0_1, %c0_2] : memref<32x640xbf16, #tpu.memory_space<vmem>>, vector<32x640xbf16>
    %cst = arith.constant dense<0.000000e+00> : vector<8x640xf32>
    %3 = tpu.matmul %1, %2, %cst {dimension_numbers = #tpu.dot_dimension_numbers<[1], [0], [0], [1], [0, 0, 1, 1], [], []>} : vector<8x32xbf16>, vector<32x640xbf16>, vector<8x640xf32> -> vector<8x640xf32>
    %c0_3 = arith.constant 0 : index
    %c0_4 = arith.constant 0 : index
    %4 = vector.load %arg3[%c0_3, %c0_4] : memref<1x640xf32, #tpu.memory_space<vmem>>, vector<1x640xf32>
    %5 = vector.broadcast %4 : vector<1x640xf32> to vector<8x640xf32>
    %6 = arith.addf %3, %5 : vector<8x640xf32>
    %cst_5 = arith.constant 0.000000e+00 : f32
    %7 = vector.broadcast %cst_5 : f32 to vector<8x640xf32>
    %8 = arith.maximumf %6, %7 : vector<8x640xf32>
    %9 = arith.truncf %8 : vector<8x640xf32> to vector<8x640xbf16>
    %c0_6 = arith.constant 0 : index
    %c0_7 = arith.constant 0 : index
    %10 = vector.load %arg4[%c0_6, %c0_7] : memref<640x256xbf16, #tpu.memory_space<vmem>>, vector<640x256xbf16>
    %cst_8 = arith.constant dense<0.000000e+00> : vector<8x256xf32>
    %11 = tpu.matmul %9, %10, %cst_8 {dimension_numbers = #tpu.dot_dimension_numbers<[1], [0], [0], [1], [0, 0, 1, 1], [], []>} : vector<8x640xbf16>, vector<640x256xbf16>, vector<8x256xf32> -> vector<8x256xf32>
    %c0_9 = arith.constant 0 : index
    %c0_10 = arith.constant 0 : index
    %12 = vector.load %arg5[%c0_9, %c0_10] : memref<1x256xf32, #tpu.memory_space<vmem>>, vector<1x256xf32>
    %13 = vector.broadcast %12 : vector<1x256xf32> to vector<8x256xf32>
    %14 = arith.addf %11, %13 : vector<8x256xf32>
    %15 = vector.extract_strided_slice %14 {offsets = [0, 0], sizes = [8, 128], strides = [1, 1]} : vector<8x256xf32> to vector<8x128xf32>
    %cst_11 = arith.constant dense<0xFF800000> : vector<8xf32>
    %16 = vector.multi_reduction <maximumf>, %15, %cst_11 [1] : vector<8x128xf32> to vector<8xf32>
    %17 = vector.shape_cast %16 : vector<8xf32> to vector<8x1xf32>
    %18 = vector.broadcast %17 : vector<8x1xf32> to vector<8x128xf32>
    %19 = arith.subf %15, %18 : vector<8x128xf32>
    %20 = math.exp %19 : vector<8x128xf32>
    %cst_12 = arith.constant dense<0.000000e+00> : vector<8xf32>
    %21 = vector.multi_reduction <add>, %20, %cst_12 [1] : vector<8x128xf32> to vector<8xf32>
    %22 = vector.shape_cast %21 : vector<8xf32> to vector<8x1xf32>
    %23 = tpu.reciprocal %22 {approx = true} : vector<8x1xf32> -> vector<8x1xf32>
    %24 = arith.mulf %22, %23 : vector<8x1xf32>
    %cst_13 = arith.constant 2.000000e+00 : f32
    %25 = vector.broadcast %cst_13 : f32 to vector<8x1xf32>
    %26 = arith.subf %25, %24 : vector<8x1xf32>
    %27 = arith.mulf %23, %26 : vector<8x1xf32>
    %28 = vector.broadcast %27 : vector<8x1xf32> to vector<8x128xf32>
    %29 = arith.mulf %20, %28 : vector<8x128xf32>
    %c0_14 = arith.constant 0 : index
    %c0_15 = arith.constant 0 : index
    %30 = vector.load %arg6[%c0_14, %c0_15] : memref<8x256xf32, #tpu.memory_space<vmem>>, vector<8x128xf32>
    tpu.vector_store %arg6[%c0_14, %c0_15], %29 {strides = array<i32>} : memref<8x256xf32, #tpu.memory_space<vmem>>, vector<8x128xf32>,
    %31 = vector.extract_strided_slice %14 {offsets = [0, 128], sizes = [8, 128], strides = [1, 1]} : vector<8x256xf32> to vector<8x128xf32>
    %c0_16 = arith.constant 0 : index
    %c128 = arith.constant 128 : index
    %32 = vector.load %arg6[%c0_16, %c128] : memref<8x256xf32, #tpu.memory_space<vmem>>, vector<8x128xf32>
    tpu.vector_store %arg6[%c0_16, %c128], %31 {strides = array<i32>} : memref<8x256xf32, #tpu.memory_space<vmem>>, vector<8x128xf32>,
    return
  }
  func.func @transform_0(%arg0: i32) -> (i32, i32) {
    %c0_i32 = arith.constant 0 : i32
    %c0_i32_0 = arith.constant 0 : i32
    return %arg0, %c0_i32 : i32, i32
  }
  func.func @transform_1(%arg0: i32) -> (i32, i32) {
    %c0_i32 = arith.constant 0 : i32
    %c0_i32_0 = arith.constant 0 : i32
    %c0_i32_1 = arith.constant 0 : i32
    return %c0_i32, %c0_i32_0 : i32, i32
  }
  func.func @transform_2(%arg0: i32) -> (i32, i32) {
    %c0_i32 = arith.constant 0 : i32
    %c0_i32_0 = arith.constant 0 : i32
    %c0_i32_1 = arith.constant 0 : i32
    return %c0_i32, %c0_i32_0 : i32, i32
  }
  func.func @transform_3(%arg0: i32) -> (i32, i32) {
    %c0_i32 = arith.constant 0 : i32
    %c0_i32_0 = arith.constant 0 : i32
    %c0_i32_1 = arith.constant 0 : i32
    return %c0_i32, %c0_i32_0 : i32, i32
  }
  func.func @transform_4(%arg0: i32) -> (i32, i32) {
    %c0_i32 = arith.constant 0 : i32
    %c0_i32_0 = arith.constant 0 : i32
    %c0_i32_1 = arith.constant 0 : i32
    return %c0_i32, %c0_i32_0 : i32, i32
  }
  func.func @transform_5(%arg0: i32) -> (i32, i32) {
    %c0_i32 = arith.constant 0 : i32
    %c0_i32_0 = arith.constant 0 : i32
    return %arg0, %c0_i32 : i32, i32
  }
}

</mosaic_0001>

<bundles_post_ra>
// kernel: classification_forward.1
= control target key start
LH: loop header
LB: loop body
LE: loop exit
PB: predicated region body
PF: predicated region fallthrough
CT: control target
= control target key end

     0   :  { %10 = vsyncpa [#allocation3], 0  ;;  %s1411_s0 = inlined_call_operand.hbm [shape: f32[8,32], index: 0, kind: input, shape index: {}]   ;;  %s1412_s1 = inlined_call_operand.hbm [shape: bf16[32,640], index: 1, kind: input, shape index: {}]   ;;  %s1413_s2 = inlined_call_operand.hbm [shape: f32[1,640], index: 2, kind: input, shape index: {}]   ;;  %s1414_s3 = inlined_call_operand.hbm [shape: bf16[640,256], index: 3, kind: input, shape index: {}]   ;;  %s1415_s4 = inlined_call_operand.vmem [shape: f32[1,256], index: 4, kind: input, shape index: {}]   ;;  %s1416_s5 = inlined_call_operand.vmem [shape: f32[8,256], index: 5, kind: output, shape index: {}]  }
   0x1   :  { %11 = vsyncpa [#allocation5], 0 }
   0x2   :  { %12 = vsyncpa [#allocation8], 0  ;;  %s1292_s18 = smov [#allocation4]   ;;  %s1198_s22 = scalar_lea.hbm %s1412_s1, 1280 }
   0x3   :  { %s28_s19 = sshll.u32 %s1292_s18, 4  ;;  %p1199_p0 = scmp.ne.s32.totalorder %s1412_s1, %s1198_s22  ;;  %s29_s19 = int_to_ptr.vmem [resolvable:$true] %s28_s19 }
   0x4   :  { %p1202_p1 = scmp.lt.u32.totalorder %s1198_s22, %s1412_s1 }
   0x6   :  { %p1204_p2 = pnand %p1202_p1, %p1199_p0 }
   0x8   :  { %1207 = shalt.err (!%p1204_p2)
}
   0x9   :  { %s1208_s27 = scalar_lea.vmem %s29_s19, 1280  ;;  %p1213_p4 = scmp.lt.s32.totalorder %s29_s19, %s29_s19 }
   0xa   :  { %p1209_p3 = scmp.ne.s32.totalorder %s29_s19, %s1208_s27  ;;  %p1214_p5 = scmp.lt.s32.totalorder %s1208_s27, %s1208_s27 }
   0xc   :  { %p1215_p6 = por %p1214_p5, %p1213_p4 }
   0xe   :  { %p1216_p7 = pnand %p1215_p6, %p1209_p3 }
  0x10   :  { %1219 = shalt.err (!%p1216_p7)
}
  0x11   :  { %s1293_s28 = smov 320   ;;  %s1294_s29 = smov 20  }
  0x12   :  { %34 = dma.hbm_to_vmem [thread:$0]  %s1412_s1, 1280, %s29_s19, [#allocation5], %s1293_s28, %s1293_s28, %s1294_s29  }
  0x13   :  { %s1295_s7 = smov [#allocation2]   ;;  %s1296_s9 = smov [#allocation6]  }
  0x14   :  { %s19_s8 = sshll.u32 %s1295_s7, 4  ;;  %s41_s10 = sshll.u32 %s1296_s9, 4  ;;  %s20_s8 = int_to_ptr.vmem [resolvable:$true] %s19_s8  ;;  %s42_s10 = int_to_ptr.vmem [resolvable:$true] %s41_s10 }
  0x15   :  { %s1220_s13 = scalar_lea.hbm %s1411_s0, 128 }
  0x16   :  { %p1221_p8 = scmp.ne.s32.totalorder %s1411_s0, %s1220_s13  ;;  %p1224_p9 = scmp.lt.u32.totalorder %s1220_s13, %s1411_s0 }
  0x18   :  { %p1226_p10 = pnand %p1224_p9, %p1221_p8 }
  0x1a   :  { %1229 = shalt.err (!%p1226_p10)
}
  0x1b   :  { %s1230_s1 = scalar_lea.vmem %s20_s8, 128  ;;  %p1235_p12 = scmp.lt.s32.totalorder %s20_s8, %s20_s8 }
  0x1c   :  { %p1231_p11 = scmp.ne.s32.totalorder %s20_s8, %s1230_s1  ;;  %p1236_p13 = scmp.lt.s32.totalorder %s1230_s1, %s1230_s1 }
  0x1e   :  { %p1237_p0 = por %p1236_p13, %p1235_p12 }
  0x20   :  { %p1238_p1 = pnand %p1237_p0, %p1231_p11 }
  0x22   :  { %1241 = shalt.err (!%p1238_p1)
}
  0x23   :  { %22 = dma.hbm_to_vmem [thread:$0]  %s1411_s0, 128, %s20_s8, [#allocation3]  }
  0x24   :  { %s1242_s22 = scalar_lea.hbm %s1413_s2, 80 }
  0x25   :  { %p1243_p2 = scmp.ne.s32.totalorder %s1413_s2, %s1242_s22  ;;  %p1246_p3 = scmp.lt.u32.totalorder %s1242_s22, %s1413_s2 }
  0x27   :  { %p1248_p4 = pnand %p1246_p3, %p1243_p2 }
  0x29   :  { %1251 = shalt.err (!%p1248_p4)
}
  0x2a   :  { %s1252_s27 = scalar_lea.vmem %s42_s10, 80  ;;  %s1256_s28 = scalar_lea.vmem %s42_s10, 96 }
  0x2b   :  { %p1253_p5 = scmp.ne.s32.totalorder %s42_s10, %s1252_s27  ;;  %p1257_p6 = scmp.lt.s32.totalorder %s42_s10, %s42_s10 }
  0x2c   :  { %p1258_p7 = scmp.lt.s32.totalorder %s1256_s28, %s1252_s27 }
  0x2e   :  { %p1259_p8 = por %p1258_p7, %p1257_p6 }
  0x30   :  { %p1260_p9 = pnand %p1259_p8, %p1253_p5 }
  0x32   :  { %1263 = shalt.err (!%p1260_p9)
}
  0x33   :  { %44 = dma.hbm_to_vmem [thread:$0]  %s1413_s2, 80, %s42_s10, [#allocation5]  }
  0x34   :  { %s1297_s30 = smov [#allocation7]   ;;  %s1264_s9 = scalar_lea.hbm %s1414_s3, 10240 }
  0x35   :  { %s50_s6 = sshll.u32 %s1297_s30, 4  ;;  %p1265_p10 = scmp.ne.s32.totalorder %s1414_s3, %s1264_s9  ;;  %s51_s6 = int_to_ptr.vmem [resolvable:$true] %s50_s6 }
  0x36   :  { %p1268_p11 = scmp.lt.u32.totalorder %s1264_s9, %s1414_s3 }
  0x38   :  { %p1270_p12 = pnand %p1268_p11, %p1265_p10 }
  0x3a   :  { %1273 = shalt.err (!%p1270_p12)
}
  0x3b   :  { %s1274_s15 = scalar_lea.vmem %s51_s6, 10240  ;;  %p1279_p0 = scmp.lt.s32.totalorder %s51_s6, %s51_s6 }
  0x3c   :  { %p1275_p13 = scmp.ne.s32.totalorder %s51_s6, %s1274_s15  ;;  %p1280_p1 = scmp.lt.s32.totalorder %s1274_s15, %s1274_s15 }
  0x3e   :  { %p1281_p2 = por %p1280_p1, %p1279_p0 }
  0x40   :  { %p1282_p3 = pnand %p1281_p2, %p1275_p13 }
  0x42   :  { %1285 = shalt.err (!%p1282_p3)
}
  0x43   :  { %s1298_s2 = smov 128   ;;  %s1299_s10 = smov 8  }
  0x44   :  { %56 = dma.hbm_to_vmem [thread:$0]  %s1414_s3, 10240, %s51_s6, [#allocation8], %s1298_s2, %s1298_s2, %s1299_s10  }
  0x45   :  { %1286 = dma.done.wait [#allocation3], 128  }
  0x46   :  { %1287 = vsyncadd [#allocation3], 4294967168 }
  0x47   :  { %1288 = dma.done.wait [#allocation5], 1360  }
  0x48   :  { %1289 = vsyncadd [#allocation5], 4294965936 }
  0x49   :  { %1290 = dma.done.wait [#allocation8], 10240  }
  0x4a   :  { %1291 = vsyncadd [#allocation8], 4294957056  ;;  %v1300_v0 = vmov 0   ;;  %v1060_v1 = vld [vmem:[#allocation4 + $0x4] ss:$20 sps:$4 sm:$0xff]   ;;  %vm165_vm0 = vcmask 261120  }
  0x4b   :  { %201 = vmatprep.mubr.bf16.mxu0 %v1300_v0  ;;  %v1062_v2 = vld [vmem:[#allocation4] ss:$20 sps:$4 sm:$0xff]   ;;  %169 = vmatprep.subr.bf16.mxu0 %v1060_v1  ;;  %v1065_v4 = vld [vmem:[#allocation4 + $0x28] ss:$20 sps:$4 sm:$0xff]   ;;  %v1069_v10 = vld [vmem:[#allocation4 + $0x30] ss:$20 sps:$4 sm:$0xff]  }
  0x4c   :  { %v1063_v3 = vld [vmem:[#allocation4 + $0x2c] ss:$20 sps:$4 sm:$0xff]   ;;  %170 = vmatpush1.bf16.msra.mxu0 %v1062_v2  ;;  %v72_v5 = vld [vmem:[#allocation2] sm:$0xff]  ;;  %v1071_v9 = vld [vmem:[#allocation4 + $0x34] ss:$20 sps:$4 sm:$0xff]   ;;  %v1301_v16 = vmov 0.0  }
  0x4d   :  { %171 = vmatprep.subr.bf16.mxu0 %v1063_v3  ;;  %v1068_v6 = vld [vmem:[#allocation4 + $0xc] ss:$20 sps:$4 sm:$0xff]   ;;  %v73_v7 = vpack.c.bf16 %v72_v5, %v72_v5  ;;  %v1066_v8 = vld [vmem:[#allocation4 + $0x8] ss:$20 sps:$4 sm:$0xff]   ;;  %v1072_v14 = vld [vmem:[#allocation4 + $0x10] ss:$20 sps:$4 sm:$0xff]  }
  0x4e   :  { %v1080_v11 = vld [vmem:[#allocation7 + $0x104] ss:$8 sps:$4 sm:$0xff]   ;;  %v1085_v12 = vld [vmem:[#allocation7 + $0x100] ss:$8 sps:$4 sm:$0xff]   ;;  %v1086_v13 = vld [vmem:[#allocation7 + $0x114] ss:$8 sps:$4 sm:$0xff]  }
  0x4f   :  { %834 = vmatprep.subr.bf16.mxu1 %v1080_v11  ;;  %v1091_v15 = vld [vmem:[#allocation7 + $0x110] ss:$8 sps:$4 sm:$0xff]   ;;  %v1092_v17 = vld [vmem:[#allocation7 + $0x124] ss:$8 sps:$4 sm:$0xff]   ;;  %v1097_v19 = vld [vmem:[#allocation7 + $0x120] ss:$8 sps:$4 sm:$0xff]  }
  0x50   :  { %172 = vmatpush1.bf16.msra.mxu0 %v1065_v4  ;;  %835 = vmatpush1.bf16.msra.mxu1 %v1085_v12  ;;  %v1073_v18 = vld [vmem:[#allocation4 + $0x38] ss:$20 sps:$4 sm:$0xff]   ;;  %vm1302_vm1 = vmmov 0  }
  0x51   :  { %210 = vmatprep.subr.bf16.mxu0 %v1068_v6  ;;  %836 = vmatprep.subr.bf16.mxu1 %v1086_v13  ;;  %v1098_v20 = vld [vmem:[#allocation7 + $0x134] ss:$8 sps:$4 sm:$0xff]   ;;  %v1076_v21 = vld [vmem:[#allocation7 + $0x4] ss:$8 sps:$4 sm:$0xff]   ;;  %v1103_v22 = vld [vmem:[#allocation7 + $0x130] ss:$8 sps:$4 sm:$0xff]  }
  0x52   :  { %v1074_v23 = vld [vmem:[#allocation7] ss:$8 sps:$4 sm:$0xff]   ;;  %v1104_v24 = vld [vmem:[#allocation7 + $0x144] ss:$8 sps:$4 sm:$0xff]   ;;  %v1079_v25 = vld [vmem:[#allocation7 + $0x14] ss:$8 sps:$4 sm:$0xff]  }
  0x53   :  { %947 = vmatmul.mubr.msk.bf16.vlgmr.msra.gmra.mrb[0].mxu0 %vm165_vm0, %v73_v7  ;;  %v1077_v26 = vld [vmem:[#allocation7 + $0x10] ss:$8 sps:$4 sm:$0xff]   ;;  %v1109_v27 = vld [vmem:[#allocation7 + $0x140] ss:$8 sps:$4 sm:$0xff]   ;;  %v1110_v28 = vld [vmem:[#allocation7 + $0x154] ss:$8 sps:$4 sm:$0xff]  }
  0x54   :  { %211 = vmatpush1.bf16.msra.mxu0 %v1066_v8  ;;  %242 = vmatprep.mubr.bf16.mxu0 %v1300_v0  ;;  %v1084_v29 = vld [vmem:[#allocation7 + $0x24] ss:$8 sps:$4 sm:$0xff]   ;;  %v1115_v30 = vld [vmem:[#allocation7 + $0x150] ss:$8 sps:$4 sm:$0xff]   ;;  %v1082_v31 = vld [vmem:[#allocation7 + $0x20] ss:$8 sps:$4 sm:$0xff]  }
  0x55   :  { %212 = vmatprep.subr.bf16.mxu0 %v1071_v9  ;;  %837 = vmatpush1.bf16.msra.mxu1 %v1091_v15  ;;  %v1116_v32 = vld [vmem:[#allocation7 + $0x164] ss:$8 sps:$4 sm:$0xff]   ;;  %v1090_v33 = vld [vmem:[#allocation7 + $0x34] ss:$8 sps:$4 sm:$0xff]   ;;  %v1088_v34 = vld [vmem:[#allocation7 + $0x30] ss:$8 sps:$4 sm:$0xff]  }
  0x56   :  { %838 = vmatprep.subr.bf16.mxu1 %v1092_v17  ;;  %v1121_v35 = vld [vmem:[#allocation7 + $0x160] ss:$8 sps:$4 sm:$0xff]   ;;  %v1122_v36 = vld [vmem:[#allocation7 + $0x174] ss:$8 sps:$4 sm:$0xff]   ;;  %v1096_v37 = vld [vmem:[#allocation7 + $0x44] ss:$8 sps:$4 sm:$0xff]  }
  0x57   :  { %v1127_v38 = vld [vmem:[#allocation7 + $0x170] ss:$8 sps:$4 sm:$0xff]   ;;  %v1094_v39 = vld [vmem:[#allocation7 + $0x40] ss:$8 sps:$4 sm:$0xff]   ;;  %v1128_v40 = vld [vmem:[#allocation7 + $0x184] ss:$8 sps:$4 sm:$0xff]  }
  0x58   :  { %213 = vmatpush1.bf16.msra.mxu0 %v1069_v10  ;;  %v1102_v41 = vld [vmem:[#allocation7 + $0x54] ss:$8 sps:$4 sm:$0xff]   ;;  %v1100_v42 = vld [vmem:[#allocation7 + $0x50] ss:$8 sps:$4 sm:$0xff]   ;;  %v1108_v43 = vld [vmem:[#allocation7 + $0x64] ss:$8 sps:$4 sm:$0xff]  }
  0x59   :  { %1033 = vmatprep.subr.bf16.mxu0 %v1301_v16  ;;  %839 = vmatpush1.bf16.msra.mxu1 %v1097_v19  ;;  %v1133_v44 = vld [vmem:[#allocation7 + $0x180] ss:$8 sps:$4 sm:$0xff]   ;;  %v1134_v45 = vld [vmem:[#allocation7 + $0x194] ss:$8 sps:$4 sm:$0xff]   ;;  %v1139_v46 = vld [vmem:[#allocation7 + $0x190] ss:$8 sps:$4 sm:$0xff]  }
  0x5a   :  { %840 = vmatprep.subr.bf16.mxu1 %v1098_v20  ;;  %v1106_v47 = vld [vmem:[#allocation7 + $0x60] ss:$8 sps:$4 sm:$0xff]   ;;  %v1140_v48 = vld [vmem:[#allocation7 + $0x1a4] ss:$8 sps:$4 sm:$0xff]   ;;  %v1114_v49 = vld [vmem:[#allocation7 + $0x74] ss:$8 sps:$4 sm:$0xff]  }
  0x5b   :  { %948 = vmatmul.mubr.msk.bf16.vlgmr.msra.gmra.mrb[4].mxu0 %vm165_vm0, %v73_v7  ;;  %v1145_v50 = vld [vmem:[#allocation7 + $0x1a0] ss:$8 sps:$4 sm:$0xff]   ;;  %v1112_v51 = vld [vmem:[#allocation7 + $0x70] ss:$8 sps:$4 sm:$0xff]   ;;  %v1146_v52 = vld [vmem:[#allocation7 + $0x1b4] ss:$8 sps:$4 sm:$0xff]  }
  0x5c   :  { %1034 = vmatpush3.bf16.msra.mxu0 %v1072_v14  ;;  %1037 = vmatprep.mubr.msk.bf16.mxu0 %vm1302_vm1, %v1301_v16  ;;  %v1120_v53 = vld [vmem:[#allocation7 + $0x84] ss:$8 sps:$4 sm:$0xff]   ;;  %v1151_v54 = vld [vmem:[#allocation7 + $0x1b0] ss:$8 sps:$4 sm:$0xff]   ;;  %v1118_v55 = vld [vmem:[#allocation7 + $0x80] ss:$8 sps:$4 sm:$0xff]  }
  0x5d   :  { %1035 = vmatprep.subr.bf16.mxu0 %v1301_v16  ;;  %841 = vmatpush1.bf16.msra.mxu1 %v1103_v22  ;;  %v1126_v56 = vld [vmem:[#allocation7 + $0x94] ss:$8 sps:$4 sm:$0xff]   ;;  %v1124_v57 = vld [vmem:[#allocation7 + $0x90] ss:$8 sps:$4 sm:$0xff]   ;;  %v1132_v58 = vld [vmem:[#allocation7 + $0xa4] ss:$8 sps:$4 sm:$0xff]   ;;  %v88_v16 = vlaneseq }
  0x5e   :  { %842 = vmatprep.subr.bf16.mxu1 %v1104_v24  ;;  %v1130_v59 = vld [vmem:[#allocation7 + $0xa0] ss:$8 sps:$4 sm:$0xff]   ;;  %v1138_v60 = vld [vmem:[#allocation7 + $0xb4] ss:$8 sps:$4 sm:$0xff]   ;;  %v1136_v61 = vld [vmem:[#allocation7 + $0xb0] ss:$8 sps:$4 sm:$0xff]  }
  0x5f   :  { %v1144_v62 = vld [vmem:[#allocation7 + $0xc4] ss:$8 sps:$4 sm:$0xff]   ;;  %v1142_v63 = vld [vmem:[#allocation7 + $0xc0] ss:$8 sps:$4 sm:$0xff]   ;;  %v1150_v1 = vld [vmem:[#allocation7 + $0xd4] ss:$8 sps:$4 sm:$0xff]  }
  0x60   :  { %1036 = vmatpush3.bf16.msra.mxu0 %v1073_v18  ;;  %v1148_v2 = vld [vmem:[#allocation7 + $0xd0] ss:$8 sps:$4 sm:$0xff]   ;;  %v1152_v3 = vld [vmem:[#allocation7 + $0x1c4] ss:$8 sps:$4 sm:$0xff]   ;;  %v1157_v5 = vld [vmem:[#allocation7 + $0x1c0] ss:$8 sps:$4 sm:$0xff]  }
  0x61   :  { %793 = vmatprep.subr.bf16.mxu0 %v1076_v21  ;;  %843 = vmatpush1.bf16.msra.mxu1 %v1109_v27  ;;  %v1156_v4 = vld [vmem:[#allocation7 + $0xe4] ss:$8 sps:$4 sm:$0xff]   ;;  %v1154_v6 = vld [vmem:[#allocation7 + $0xe0] ss:$8 sps:$4 sm:$0xff]   ;;  %v1162_v8 = vld [vmem:[#allocation7 + $0xf4] ss:$8 sps:$4 sm:$0xff]  }
  0x62   :  { %844 = vmatprep.subr.bf16.mxu1 %v1110_v28  ;;  %v1163_v9 = vld [vmem:[#allocation7 + $0x1d0] ss:$8 sps:$4 sm:$0xff]   ;;  %v1164_v11 = vld [vmem:[#allocation7 + $0x1e4] ss:$8 sps:$4 sm:$0xff]   ;;  %v1166_v12 = vld [vmem:[#allocation7 + $0x1e0] ss:$8 sps:$4 sm:$0xff]  }
  0x63   :  { %1038 = vmatmul.mubr.msk.bf16.vlgmr.msra.gmra.mrb[8].mxu0 %vm165_vm0, %v73_v7  ;;  %v1158_v7 = vld [vmem:[#allocation7 + $0x1d4] ss:$8 sps:$4 sm:$0xff]   ;;  %v1160_v10 = vld [vmem:[#allocation7 + $0xf0] ss:$8 sps:$4 sm:$0xff]   ;;  %v1172_v15 = vld [vmem:[#allocation7 + $0x204] ss:$8 sps:$4 sm:$0xff]  }
  0x64   :  { %794 = vmatpush1.bf16.msra.mxu0 %v1074_v23  ;;  %v1167_v13 = vld [vmem:[#allocation7 + $0x1f4] ss:$8 sps:$4 sm:$0xff]   ;;  %v1169_v14 = vld [vmem:[#allocation7 + $0x1f0] ss:$8 sps:$4 sm:$0xff]   ;;  %v1386_v17 = vshrl.u32 %v88_v16, 7 }
  0x65   :  { %795 = vmatprep.subr.bf16.mxu0 %v1079_v25  ;;  %845 = vmatpush1.bf16.msra.mxu1 %v1115_v30  ;;  %v86_v19 = vld [vmem:[#allocation6] sm:$0x1f] }
  0x66   :  { %846 = vmatprep.subr.bf16.mxu1 %v1116_v32  ;;  %v90_v18 = vsub.s32 0, %v1386_v17  ;;  %v94_v20 = vsub.s32 1, %v1386_v17 }
  0x68   :  { %796 = vmatpush1.bf16.msra.mxu0 %v1077_v26  ;;  %v91_v21 = vrot.slane %v86_v19, %v90_v18  ;;  %v95_v22 = vrot.slane %v86_v19, %v94_v20  ;;  %v98_v26 = vsub.s32 2, %v1386_v17 }
  0x69   :  { %797 = vmatprep.subr.bf16.mxu0 %v1084_v29  ;;  %847 = vmatpush1.bf16.msra.mxu1 %v1121_v35  ;;  %v102_v29 = vsub.s32 3, %v1386_v17 }
  0x6a   :  { %848 = vmatprep.subr.bf16.mxu1 %v1122_v36 }
  0x6b   :  { %v103_v35 = vrot.slane %v86_v19, %v102_v29 }
  0x6c   :  { %798 = vmatpush1.bf16.msra.mxu0 %v1082_v31 }
  0x6d   :  { %799 = vmatprep.subr.bf16.mxu0 %v1090_v33  ;;  %849 = vmatpush1.bf16.msra.mxu1 %v1127_v38  ;;  %v99_v33 = vrot.slane %v86_v19, %v98_v26 }
  0x6e   :  { %850 = vmatprep.subr.bf16.mxu1 %v1128_v40 }
  0x70   :  { %800 = vmatpush1.bf16.msra.mxu0 %v1088_v34 }
  0x71   :  { %801 = vmatprep.subr.bf16.mxu0 %v1096_v37  ;;  %851 = vmatpush1.bf16.msra.mxu1 %v1133_v44 }
  0x72   :  { %852 = vmatprep.subr.bf16.mxu1 %v1134_v45 }
  0x74   :  { %802 = vmatpush1.bf16.msra.mxu0 %v1094_v39 }
  0x75   :  { %803 = vmatprep.subr.bf16.mxu0 %v1102_v41  ;;  %853 = vmatpush1.bf16.msra.mxu1 %v1139_v46  ;;  %v1170_v46 = vld [vmem:[#allocation7 + $0x200] ss:$8 sps:$4 sm:$0xff]  }
  0x76   :  { %854 = vmatprep.subr.bf16.mxu1 %v1140_v48  ;;  %v1175_v48 = vld [vmem:[#allocation7 + $0x214] ss:$8 sps:$4 sm:$0xff]  }
  0x78   :  { %804 = vmatpush1.bf16.msra.mxu0 %v1100_v42 }
  0x79   :  { %805 = vmatprep.subr.bf16.mxu0 %v1108_v43  ;;  %855 = vmatpush1.bf16.msra.mxu1 %v1145_v50 }
  0x7a   :  { %856 = vmatprep.subr.bf16.mxu1 %v1146_v52 }
  0x7c   :  { %806 = vmatpush1.bf16.msra.mxu0 %v1106_v47 }
  0x7d   :  { %807 = vmatprep.subr.bf16.mxu0 %v1114_v49  ;;  %857 = vmatpush1.bf16.msra.mxu1 %v1151_v54 }
  0x7e   :  { %858 = vmatprep.subr.bf16.mxu1 %v1152_v3  ;;  %v1193_v3 = vld [vmem:[#allocation7 + $0x274] ss:$8 sps:$4 sm:$0xff]  }
  0x80   :  { %808 = vmatpush1.bf16.msra.mxu0 %v1112_v51  ;;  %v1173_v51 = vld [vmem:[#allocation7 + $0x210] ss:$8 sps:$4 sm:$0xff]  }
  0x81   :  { %809 = vmatprep.subr.bf16.mxu0 %v1120_v53  ;;  %859 = vmatpush1.bf16.msra.mxu1 %v1157_v5  ;;  %v1178_v53 = vld [vmem:[#allocation7 + $0x224] ss:$8 sps:$4 sm:$0xff]   ;;  %v1191_v5 = vld [vmem:[#allocation7 + $0x270] ss:$8 sps:$4 sm:$0xff]  }
  0x82   :  { %860 = vmatprep.subr.bf16.mxu1 %v1158_v7 }
  0x84   :  { %810 = vmatpush1.bf16.msra.mxu0 %v1118_v55  ;;  %v1176_v55 = vld [vmem:[#allocation7 + $0x220] ss:$8 sps:$4 sm:$0xff]  }
  0x85   :  { %811 = vmatprep.subr.bf16.mxu0 %v1126_v56  ;;  %861 = vmatpush1.bf16.msra.mxu1 %v1163_v9  ;;  %v1181_v56 = vld [vmem:[#allocation7 + $0x234] ss:$8 sps:$4 sm:$0xff]  }
  0x86   :  { %862 = vmatprep.subr.bf16.mxu1 %v1164_v11  ;;  %v381_v11 = vld [vmem:[%s1415_s4] sm:$0x3] }
  0x88   :  { %812 = vmatpush1.bf16.msra.mxu0 %v1124_v57  ;;  %v1179_v57 = vld [vmem:[#allocation7 + $0x230] ss:$8 sps:$4 sm:$0xff]  }
  0x89   :  { %813 = vmatprep.subr.bf16.mxu0 %v1132_v58  ;;  %863 = vmatpush1.bf16.msra.mxu1 %v1166_v12  ;;  %v1184_v58 = vld [vmem:[#allocation7 + $0x244] ss:$8 sps:$4 sm:$0xff]   ;;  %v386_v12 = vrot.slane %v381_v11, %v90_v18 }
  0x8a   :  { %864 = vmatprep.subr.bf16.mxu1 %v1167_v13  ;;  %v390_v13 = vrot.slane %v381_v11, %v94_v20 }
  0x8c   :  { %814 = vmatpush1.bf16.msra.mxu0 %v1130_v59  ;;  %v106_v59 = vsub.s32 4, %v1386_v17 }
  0x8d   :  { %815 = vmatprep.subr.bf16.mxu0 %v1138_v60  ;;  %865 = vmatpush1.bf16.msra.mxu1 %v1169_v14  ;;  %v1182_v60 = vld [vmem:[#allocation7 + $0x240] ss:$8 sps:$4 sm:$0xff]  }
  0x8e   :  { %875 = vmatprep.subr.bf16.mxu1 %v1172_v15 }
  0x90   :  { %816 = vmatpush1.bf16.msra.mxu0 %v1136_v61  ;;  %v1187_v61 = vld [vmem:[#allocation7 + $0x254] ss:$8 sps:$4 sm:$0xff]  }
  0x91   :  { %817 = vmatprep.subr.bf16.mxu0 %v1144_v62  ;;  %v107_v62 = vrot.slane %v86_v19, %v106_v59 }
  0x94   :  { %818 = vmatpush1.bf16.msra.mxu0 %v1142_v63  ;;  %v1190_v63 = vld [vmem:[#allocation7 + $0x264] ss:$8 sps:$4 sm:$0xff]  }
  0x95   :  { %819 = vmatprep.subr.bf16.mxu0 %v1150_v1 }
  0x98   :  { %820 = vmatpush1.bf16.msra.mxu0 %v1148_v2  ;;  %v1188_v2 = vld [vmem:[#allocation7 + $0x260] ss:$8 sps:$4 sm:$0xff]  }
  0x99   :  { %821 = vmatprep.subr.bf16.mxu0 %v1156_v4 }
  0x9c   :  { %822 = vmatpush1.bf16.msra.mxu0 %v1154_v6 }
  0x9d   :  { %823 = vmatprep.subr.bf16.mxu0 %v1162_v8 }
  0xa0   :  { %824 = vmatpush1.bf16.msra.mxu0 %v1160_v10 }
 0x126   :  { %v203_v23 = vpop.f32.mrb[0].mxu0 }
 0x127   :  { %v204_v24 = vadd.f32 %v203_v23, %v91_v21  ;;  %v205_v25 = vpop.f32.mrb[1].mxu0 }
 0x128   :  { %v206_v27 = vadd.f32 %v205_v25, %v95_v22  ;;  %v207_v28 = vpop.f32.mrb[2].mxu0 }
 0x129   :  { %v291_v30 = vmax.f32 %v204_v24, 0.0  ;;  %v208_v31 = vpop.f32.mrb[3].mxu0 }
 0x12a   :  { %v292_v32 = vmax.f32 %v206_v27, 0.0 }
 0x12b   :  { %v296_v36 = vpack.c.bf16 %v291_v30, %v291_v30 }
 0x12c   :  { %v297_v34 = vpack.c.bf16 %v292_v32, %v292_v32 }
 0x12e   :  { %v244_v37 = vpop.f32.mrb[4].mxu0  ;;  %825 = vmatprep.mubr.bf16.mxu0 %v297_v34 }
 0x12f   :  { %v245_v38 = vadd.f32 %v244_v37, %v99_v33  ;;  %v246_v39 = vpop.f32.mrb[5].mxu0  ;;  %826 = vmatmul.mubr.bf16.vlgmr.msra.gmra.mrb[12].mxu0 %v296_v36 }
 0x130   :  { %v247_v40 = vadd.f32 %v246_v39, %v103_v35  ;;  %v248_v41 = vpop.f32.mrb[6].mxu0 }
 0x131   :  { %v293_v42 = vmax.f32 %v245_v38, 0.0  ;;  %v249_v43 = vpop.f32.mrb[7].mxu0 }
 0x132   :  { %v294_v44 = vmax.f32 %v247_v40, 0.0 }
 0x133   :  { %v298_v47 = vpack.c.bf16 %v293_v42, %v293_v42 }
 0x134   :  { %v299_v45 = vpack.c.bf16 %v294_v44, %v294_v44 }
 0x136   :  { %866 = vmatprep.mubr.bf16.mxu1 %v299_v45  ;;  %v285_v49 = vpop.f32.mrb[8].mxu0 }
 0x137   :  { %867 = vmatmul.mubr.bf16.vlgmr.msra.gmra.mrb[0].mxu1 %v298_v47  ;;  %v1039_v50 = vpop.f32.mrb[9].mxu0  ;;  %v286_v1 = vadd.f32 %v285_v49, %v107_v62 }
 0x138   :  { %876 = vmatpush1.bf16.msra.mxu1 %v1170_v46  ;;  %v288_v52 = vpop.f32.mrb[10].mxu0  ;;  %907 = vmatprep.mubr.bf16.mxu1 %v1300_v0  ;;  %v1185_v0 = vld [vmem:[#allocation7 + $0x250] ss:$8 sps:$4 sm:$0xff]  }
 0x139   :  { %877 = vmatprep.subr.bf16.mxu1 %v1175_v48  ;;  %v1040_v54 = vpop.f32.mrb[11].mxu0  ;;  %v295_v4 = vmax.f32 %v286_v1, 0.0 }
 0x13b   :  { %v300_v6 = vpack.c.bf16 %v295_v4, %v295_v4 }
 0x13c   :  { %878 = vmatpush1.bf16.msra.mxu1 %v1173_v51 }
 0x13d   :  { %879 = vmatprep.subr.bf16.mxu1 %v1178_v53 }
 0x140   :  { %880 = vmatpush1.bf16.msra.mxu1 %v1176_v55 }
 0x141   :  { %881 = vmatprep.subr.bf16.mxu1 %v1181_v56 }
 0x144   :  { %882 = vmatpush1.bf16.msra.mxu1 %v1179_v57 }
 0x145   :  { %883 = vmatprep.subr.bf16.mxu1 %v1184_v58 }
 0x148   :  { %884 = vmatpush1.bf16.msra.mxu1 %v1182_v60 }
 0x149   :  { %885 = vmatprep.subr.bf16.mxu1 %v1187_v61 }
 0x14c   :  { %886 = vmatpush1.bf16.msra.mxu1 %v1185_v0 }
 0x14d   :  { %887 = vmatprep.subr.bf16.mxu1 %v1190_v63 }
 0x150   :  { %888 = vmatpush1.bf16.msra.mxu1 %v1188_v2 }
 0x151   :  { %889 = vmatprep.subr.bf16.mxu1 %v1193_v3 }
 0x154   :  { %890 = vmatpush1.bf16.msra.mxu1 %v1191_v5 }
 0x157   :  { %908 = vmatmul.mubr.bf16.vlgmr.msra.gmra.mrb[0].mxu1 %v300_v6 }
 0x202   :  { %v827_v7 = vpop.f32.mrb[12].mxu0 }
 0x203   :  { %v829_v8 = vpop.f32.mrb[13].mxu0  ;;  %v828_v14 = vadd.f32 %v827_v7, %v386_v12 }
 0x204   :  { %v831_v9 = vpop.f32.mrb[14].mxu0  ;;  %v830_v15 = vadd.f32 %v829_v8, %v390_v13 }
 0x205   :  { %v832_v10 = vpop.f32.mrb[15].mxu0 }
 0x22a   :  { %v909_v16 = vpop.f32.mrb[0].mxu1 }
 0x22b   :  { %v1042_v19 = vadd.f32 %v909_v16, %v828_v14  ;;  %v911_v21 = vpop.f32.mrb[1].mxu1 }
 0x22c   :  { %v1044_v22 = vadd.f32 %v911_v21, %v830_v15  ;;  %v913_v23 = vpop.f32.mrb[2].mxu1 }
 0x22d   :  { %v914_v24 = vpop.f32.mrb[3].mxu1  ;;  %916 = vmax.xlane.f32.xlu0 %v1042_v19 }
 0x22e   :  { %929 = vst [vmem:[%s1416_s5 + $0x8] sm:$0xff] %v1044_v22 }
 0x2ba   :  { %v917_v25 = vpop.xlane.xlu0 %916 }
 0x2bb   :  { %v918_v26 = vsub.f32 %v1042_v19, %v917_v25 }
 0x2bd   :  { %v919_v27 = vmul.f32 1.442695, %v918_v26 }
 0x2bf   :  { %1194 = vpow2.f32 %v919_v27 }
 0x2c9   :  { %v1195_v18 = vpop.eup %1194 }
 0x2ca   :  { %921 = vadd.xlane.f32.xlu0 %v1195_v18 }
 0x357   :  { %v922_v17 = vpop.xlane.xlu0 %921 }
 0x358   :  { %1196 = vrcp.f32 %v922_v17 }
 0x362   :  { %v1197_v20 = vpop.eup %1196 }
 0x363   :  { %v924_v28 = vmul.f32 %v1197_v20, %v922_v17 }
 0x365   :  { %v925_v29 = vsub.f32 2.0, %v924_v28 }
 0x367   :  { %v926_v30 = vmul.f32 %v1197_v20, %v925_v29 }
 0x369   :  { %v927_v31 = vmul.f32 %v1195_v18, %v926_v30 }
 0x36b   :  { %928 = vst [vmem:[%s1416_s5] sm:$0xff] %v927_v31 }
 0x36c   :  { %934 = vsyncpa [#allocation3], 1 }
 0x36d   :  { %935 = vsyncpa [#allocation5], 1 }
 0x36e   :  { %936 = vsyncpa [#allocation8], 1 }

</bundles_post_ra>
